<compile_context>
chip_gen: v6e
topology: v6e:2x2x1
jax: 0.10.0
libtpu: 0.0.40
codegen_flags: <defaults>
</compile_context>

<pallas_src>
import functools

import jax
import jax.numpy as jnp
from jax.experimental import pallas as pl
from jax.experimental.pallas import tpu as pltpu

BN_EPS = 1e-5
LANE = 128
VMEM_LIMIT = 32 * 1024 * 1024  # raise v5e's 16 MiB scoped default; safe on v6e/v7x


def _round_up(x, m):
    return (x + m - 1) // m * m


# ----------------------------- Pallas kernels ------------------------------

def _mm_bias_kernel(x_ref, w_ref, b_ref, o_ref, *, relu):
    # y = x @ w + bias   (1x1 conv, BN scale pre-folded into w)
    y = jnp.dot(x_ref[...], w_ref[...], preferred_element_type=jnp.float32)
    y = y + b_ref[...]
    if relu:
        y = jnp.maximum(y, 0.0)
    o_ref[...] = y.astype(o_ref.dtype)


def _mm_relu_add_iden_kernel(x_ref, w_ref, b_ref, r_ref, o_ref):
    # y = relu(x @ w + bias) + residual   (identity skip, residual kept f32)
    y = jnp.dot(x_ref[...], w_ref[...], preferred_element_type=jnp.float32)
    y = jnp.maximum(y + b_ref[...], 0.0)
    o_ref[...] = (y + r_ref[...]).astype(o_ref.dtype)


def _mm_relu_add_proj_kernel(x_ref, w_ref, b_ref, r_ref, wd_ref, bd_ref, o_ref):
    # y = relu(x @ w + b) + (xs @ w_ds + b_ds)   (projection shortcut fused)
    y = jnp.dot(x_ref[...], w_ref[...], preferred_element_type=jnp.float32)
    y = jnp.maximum(y + b_ref[...], 0.0)
    s = jnp.dot(r_ref[...], wd_ref[...], preferred_element_type=jnp.float32)
    o_ref[...] = (y + s + bd_ref[...]).astype(o_ref.dtype)


def _conv3x3_kernel(x_ref, w_ref, b_ref, o_ref, *, taps, lout):
    # x_ref: (P, 1, L, Cp) phase-decomposed, row-flattened padded input (bf16)
    # w_ref: (9, Cp, Cp) tap weights (BN scale folded), b_ref: (1, Cp) f32
    # 9 shifted matmuls accumulated in f32 -- no HBM im2col.
    acc = None
    for t, (p, r) in enumerate(taps):
        xt = x_ref[p, 0, r:r + lout, :]
        c = jnp.dot(xt, w_ref[t], preferred_element_type=jnp.float32)
        acc = c if acc is None else acc + c
    o_ref[0, :, :] = (acc + b_ref[...]).astype(o_ref.dtype)


# ------------------------------ call wrappers -------------------------------

def _pick_tm(m, k, c):
    """Row-tile from a VMEM budget; guarantee >=2 grid steps when m allows."""
    budget = 8 * 1024 * 1024
    tm = 512
    # double-buffered bf16 x + f32 out + bf16 weights
    while tm > 16 and (2 * tm * k * 2 + 2 * tm * c * 4 + 2 * k * c * 2) > budget:
        tm //= 2
    if tm >= m:
        tm = m if m <= 8 else min(m, _round_up(-(-m // 2), 8))
    return tm


def _mosaic_params():
    return pltpu.CompilerParams(dimension_semantics=("parallel",),
                                vmem_limit_bytes=VMEM_LIMIT)


def _mm_bias(x, w, bias, *, relu=False, out_dtype=jnp.bfloat16):
    m, k = x.shape
    c = w.shape[1]
    tm = _pick_tm(m, k, c)
    cost = pl.CostEstimate(
        flops=2 * m * k * c, transcendentals=0,
        bytes_accessed=m * k * 2 + k * c * 2 + m * c * jnp.dtype(out_dtype).itemsize)
    return pl.pallas_call(
        functools.partial(_mm_bias_kernel, relu=relu),
        out_shape=jax.ShapeDtypeStruct((m, c), out_dtype),
        grid=(pl.cdiv(m, tm),),
        in_specs=[pl.BlockSpec((tm, k), lambda i: (i, 0)),
                  pl.BlockSpec((k, c), lambda i: (0, 0)),
                  pl.BlockSpec((1, c), lambda i: (0, 0))],
        out_specs=pl.BlockSpec((tm, c), lambda i: (i, 0)),
        compiler_params=_mosaic_params(),
        cost_estimate=cost,
    )(x, w, bias)


def _mm_relu_add_iden(h2, w, bias, res):
    m, k = h2.shape
    c = w.shape[1]
    tm = _pick_tm(m, k, c)
    cost = pl.CostEstimate(
        flops=2 * m * k * c + 2 * m * c, transcendentals=0,
        bytes_accessed=m * k * 2 + k * c * 2 + m * c * 4 + m * c * 4)
    return pl.pallas_call(
        _mm_relu_add_iden_kernel,
        out_shape=jax.ShapeDtypeStruct((m, c), jnp.float32),
        grid=(pl.cdiv(m, tm),),
        in_specs=[pl.BlockSpec((tm, k), lambda i: (i, 0)),
                  pl.BlockSpec((k, c), lambda i: (0, 0)),
                  pl.BlockSpec((1, c), lambda i: (0, 0)),
                  pl.BlockSpec((tm, c), lambda i: (i, 0))],
        out_specs=pl.BlockSpec((tm, c), lambda i: (i, 0)),
        compiler_params=_mosaic_params(),
        cost_estimate=cost,
    )(h2, w, bias, res)


def _mm_relu_add_proj(h2, w, bias, xs, wds, bds):
    m, k = h2.shape
    kr = xs.shape[1]
    c = w.shape[1]
    tm = _pick_tm(m, k + kr, c)
    cost = pl.CostEstimate(
        flops=2 * m * (k + kr) * c, transcendentals=0,
        bytes_accessed=m * (k + kr) * 2 + (k + kr) * c * 2 + m * c * 4)
    return pl.pallas_call(
        _mm_relu_add_proj_kernel,
        out_shape=jax.ShapeDtypeStruct((m, c), jnp.float32),
        grid=(pl.cdiv(m, tm),),
        in_specs=[pl.BlockSpec((tm, k), lambda i: (i, 0)),
                  pl.BlockSpec((k, c), lambda i: (0, 0)),
                  pl.BlockSpec((1, c), lambda i: (0, 0)),
                  pl.BlockSpec((tm, kr), lambda i: (i, 0)),
                  pl.BlockSpec((kr, c), lambda i: (0, 0)),
                  pl.BlockSpec((1, c), lambda i: (0, 0))],
        out_specs=pl.BlockSpec((tm, c), lambda i: (i, 0)),
        compiler_params=_mosaic_params(),
        cost_estimate=cost,
    )(h2, w, bias, xs, wds, bds)


def _conv3x3_bn(h1, w9, bias, *, stride):
    """3x3, pad 1, stride 1 or 2.  h1: (N,H,W,Cp) bf16 -> (N,Ho,Wo,Cp) bf16."""
    n, h, w, cp = h1.shape
    if stride == 1:
        ho, wo = h, w
        hph, wph = h + 2, w + 2
        xp = jnp.pad(h1, ((0, 0), (1, 1), (1, 1), (0, 0)))
        phases = xp[None]                                    # (1, N, hph, wph, Cp)
        taps = [(0, kh * wph + kw) for kh in range(3) for kw in range(3)]
    else:
        ho, wo = (h - 1) // 2 + 1, (w - 1) // 2 + 1
        hph, wph = ho + 1, wo + 1
        xp = jnp.pad(h1, ((0, 0), (1, 2), (1, 2), (0, 0)))
        phases = jnp.stack(
            [xp[:, p:p + 2 * hph:2, q:q + 2 * wph:2, :] for p in (0, 1) for q in (0, 1)],
            axis=0)                                          # (4, N, hph, wph, Cp)
        taps = [(2 * (kh % 2) + (kw % 2), (kh // 2) * wph + (kw // 2))
                for kh in range(3) for kw in range(3)]
    p_cnt = phases.shape[0]
    l_full = hph * wph + 8                                   # slack rows for last-tap offsets
    xf = jnp.pad(phases.reshape(p_cnt, n, hph * wph, cp), ((0, 0), (0, 0), (0, 8), (0, 0)))
    lout = ho * wph                                          # wrap columns dropped afterwards
    cost = pl.CostEstimate(
        flops=2 * 9 * n * lout * cp * cp, transcendentals=0,
        bytes_accessed=p_cnt * n * l_full * cp * 2 + 9 * cp * cp * 2 + n * lout * cp * 2)
    out = pl.pallas_call(
        functools.partial(_conv3x3_kernel, taps=taps, lout=lout),
        out_shape=jax.ShapeDtypeStruct((n, lout, cp), jnp.bfloat16),
        grid=(n,),
        in_specs=[pl.BlockSpec((p_cnt, 1, l_full, cp), lambda i: (0, i, 0, 0)),
                  pl.BlockSpec((9, cp, cp), lambda i: (0, 0, 0)),
                  pl.BlockSpec((1, cp), lambda i: (0, 0))],
        out_specs=pl.BlockSpec((1, lout, cp), lambda i: (i, 0, 0)),
        compiler_params=_mosaic_params(),
        cost_estimate=cost,
    )(xf, w9, bias)
    out = out.reshape(n, ho, wph, cp)[:, :, :wo, :]          # drop wrap-around columns
    return out, ho, wo


# ------------------------------ glue helpers -------------------------------

def _bn_fold(bn):
    scale = bn["gamma"] / jnp.sqrt(bn["var"] + BN_EPS)
    bias = bn["beta"] - bn["mean"] * scale
    return scale, bias  # f32


def _fold_w_1x1(w_oihw, scale, cin_p, cout_p):
    # (Cout, Cin, 1, 1) -> (Cin_p, Cout_p) bf16 with BN scale folded (in f32 first).
    w = jnp.transpose(w_oihw[:, :, 0, 0]) * scale[None, :]
    w = jnp.pad(w, ((0, cin_p - w.shape[0]), (0, cout_p - w.shape[1])))
    return w.astype(jnp.bfloat16)


def _fold_w_3x3(w_oihw, scale, cin_p, cout_p):
    # (Cout, Cin, 3, 3) -> (9, Cin_p, Cout_p) bf16, tap order kh*3 + kw.
    w = jnp.transpose(w_oihw, (2, 3, 1, 0)) * scale[None, None, None, :]
    w = jnp.pad(w, ((0, 0), (0, 0), (0, cin_p - w.shape[2]), (0, cout_p - w.shape[3])))
    return w.reshape(9, cin_p, cout_p).astype(jnp.bfloat16)


def _pad_bias(b, cp):
    return jnp.pad(b, (0, cp - b.shape[0])).reshape(1, cp).astype(jnp.float32)


# --------------------------- Bottleneck forward -----------------------------

def bottleneck_forward(x_nchw, params, *, downsampling=False, first_layer=False):
    # TODO(synk): in a stacked ResNet keep NHWC between blocks to avoid these
    # boundary transposes; kept here because the per-block API is NCHW.
    x = jnp.transpose(x_nchw, (0, 2, 3, 1)).astype(jnp.float32)   # NHWC
    n, h, w, cin = x.shape
    cmid = params["w1"].shape[0]
    cout = params["w3"].shape[0]
    cin_p = _round_up(cin, LANE)
    cmid_p = _round_up(cmid, LANE)
    cout_p = _round_up(cout, LANE)

    if not (downsampling or first_layer):
        assert cin == cout, "identity skip requires Cin == Cout"

    x_pad = jnp.pad(x, ((0, 0), (0, 0), (0, 0), (0, cin_p - cin)))  # f32, channel-padded
    x_bf = x_pad.astype(jnp.bfloat16)

    # conv1 (1x1) + bn1  (no ReLU in this module)
    s1, b1 = _bn_fold(params["bn1"])
    w1 = _fold_w_1x1(params["w1"], s1, cin_p, cmid_p)
    h1 = _mm_bias(x_bf.reshape(n * h * w, cin_p), w1, _pad_bias(b1, cmid_p))
    h1 = h1.reshape(n, h, w, cmid_p)                               # bf16

    # conv2 (3x3, pad 1, stride 2 if downsampling) + bn2 — in-kernel 9-tap accumulation
    stride = 2 if downsampling else 1
    s2, b2 = _bn_fold(params["bn2"])
    w2 = _fold_w_3x3(params["w2"], s2, cmid_p, cmid_p)
    h2, ho, wo = _conv3x3_bn(h1, w2, _pad_bias(b2, cmid_p), stride=stride)
    m2 = n * ho * wo
    h2r = h2.reshape(m2, cmid_p)

    # conv3 (1x1) + bn3 + Dropout2d + ReLU, then += shortcut (no ReLU after add)
    # TODO(synk): Dropout2d(0.1) training-mode stochastic channel dropout not
    # implemented; eval-mode (identity) semantics used; BN uses running stats.
    s3, b3 = _bn_fold(params["bn3"])
    w3 = _fold_w_1x1(params["w3"], s3, cmid_p, cout_p)
    b3p = _pad_bias(b3, cout_p)

    if downsampling or first_layer:
        ds = 1 if first_layer else 2
        xs = x_bf[:, ::ds, ::ds, :].reshape(m2, cin_p)             # 1x1 stride-s == subsample
        sds, bds = _bn_fold(params["bn_ds"])
        wds = _fold_w_1x1(params["w_ds"], sds, cin_p, cout_p)
        out = _mm_relu_add_proj(h2r, w3, b3p, xs, wds, _pad_bias(bds, cout_p))
    else:
        res = x_pad.reshape(m2, cin_p)                             # f32 identity residual
        out = _mm_relu_add_iden(h2r, w3, b3p, res)

    out = out.reshape(n, ho, wo, cout_p)[:, :, :, :cout]
    return jnp.transpose(out, (0, 3, 1, 2))                        # back to NCHW, f32


# --------------------- deterministic parameter creation ---------------------

def init_bottleneck_params(key, cin, cout):
    cmid = cout // 4
    ks = jax.random.split(key, 8)

    def conv_w(k, co, ci, kh, kw):
        return 0.1 * jax.random.normal(k, (co, ci, kh, kw), jnp.float32)

    def bn_p(k, c):
        k1, k2, k3, k4 = jax.random.split(k, 4)
        return dict(
            gamma=1.0 + 0.1 * jax.random.normal(k1, (c,), jnp.float32),
            beta=0.1 * jax.random.normal(k2, (c,), jnp.float32),
            mean=0.1 * jax.random.normal(k3, (c,), jnp.float32),
            var=1.0 + 0.1 * jnp.abs(jax.random.normal(k4, (c,), jnp.float32)),
        )

    return dict(
        w1=conv_w(ks[0], cmid, cin, 1, 1), bn1=bn_p(ks[1], cmid),
        w2=conv_w(ks[2], cmid, cmid, 3, 3), bn2=bn_p(ks[3], cmid),
        w3=conv_w(ks[4], cout, cmid, 1, 1), bn3=bn_p(ks[5], cout),
        w_ds=conv_w(ks[6], cout, cin, 1, 1), bn_ds=bn_p(ks[7], cout),
    )


# ----------------------- pure-JAX reference (lax.conv) ----------------------

def _conv_nchw(x, w, stride, padding):
    return jax.lax.conv_general_dilated(
        x, w, window_strides=(stride, stride), padding=padding,
        dimension_numbers=("NCHW", "OIHW", "NCHW"))


def _bn_nchw(x, bn):
    g = bn["gamma"][None, :, None, None]
    b = bn["beta"][None, :, None, None]
    m = bn["mean"][None, :, None, None]
    v = bn["var"][None, :, None, None]
    return g * (x - m) / jnp.sqrt(v + BN_EPS) + b


def bottleneck_reference(x, params, *, downsampling=False, first_layer=False):
    stride = 2 if downsampling else 1
    h = _bn_nchw(_conv_nchw(x, params["w1"], 1, "VALID"), params["bn1"])
    h = _bn_nchw(_conv_nchw(h, params["w2"], stride, [(1, 1), (1, 1)]), params["bn2"])
    h = _bn_nchw(_conv_nchw(h, params["w3"], 1, "VALID"), params["bn3"])
    h = jnp.maximum(h, 0.0)  # dropout (eval) is identity; ReLU before the residual add
    if downsampling or first_layer:
        ds_stride = 1 if first_layer else 2
        sc = _bn_nchw(_conv_nchw(x, params["w_ds"], ds_stride, "VALID"), params["bn_ds"])
    else:
        sc = x
    return h + sc


# ---------------------------------- main ------------------------------------

if __name__ == "__main__":
    key = jax.random.PRNGKey(0)
    N, H, W = 2, 8, 8
    configs = [
        dict(cin=16, cout=16, downsampling=False, first_layer=False),  # identity skip
        dict(cin=8,  cout=16, downsampling=False, first_layer=True),   # projection skip
        dict(cin=16, cout=32, downsampling=True,  first_layer=False),  # stride-2 block
    ]
    for i, cfg in enumerate(configs):
        kp, kx, key = jax.random.split(key, 3)
        params = init_bottleneck_params(kp, cfg["cin"], cfg["cout"])
        x = jax.random.normal(kx, (N, cfg["cin"], H, W), jnp.float32)

        out = bottleneck_forward(
            x, params, downsampling=cfg["downsampling"], first_layer=cfg["first_layer"])
        out = jax.block_until_ready(out)

        ref = bottleneck_reference(
            x, params, downsampling=cfg["downsampling"], first_layer=cfg["first_layer"])
        assert out.shape == ref.shape, (out.shape, ref.shape)
        err = float(jnp.max(jnp.abs(out - ref)))
        tol = 3e-2 * max(1.0, float(jnp.max(jnp.abs(ref))))  # bf16 activations/weights
        assert err < tol, f"config {i}: max abs err {err} (tol {tol})"

    print("KERNEL_OK")
</pallas_src>

<mosaic_0001>
module attributes {stable_mosaic.version = 11 : i64} {
  func.func @_mm_bias_kernel(%arg0: i32, %arg1: memref<64x128xbf16, #tpu.memory_space<vmem>>, %arg2: memref<128x128xbf16, #tpu.memory_space<vmem>>, %arg3: memref<1x128xf32, #tpu.memory_space<vmem>>, %arg4: memref<64x128xbf16, #tpu.memory_space<vmem>>) attributes {dimension_semantics = [#tpu.dimension_semantics<parallel>], iteration_bounds = array<i64: 2>, scalar_prefetch = 0 : i64, scratch_operands = 0 : i64, tpu.core_type = #tpu.core_type<tc>, window_params = [{transform_indices = @transform_0, window_bounds = array<i64: 64, 128>}, {pipeline_mode = #tpu.pipeline_mode<synchronous>, transform_indices = @transform_1, window_bounds = array<i64: 128, 128>}, {pipeline_mode = #tpu.pipeline_mode<synchronous>, transform_indices = @transform_2, window_bounds = array<i64: 1, 128>}, {transform_indices = @transform_3, window_bounds = array<i64: 64, 128>}]} {
    %c0 = arith.constant 0 : index
    %c0_0 = arith.constant 0 : index
    %0 = vector.load %arg1[%c0, %c0_0] : memref<64x128xbf16, #tpu.memory_space<vmem>>, vector<64x128xbf16>
    %c0_1 = arith.constant 0 : index
    %c0_2 = arith.constant 0 : index
    %1 = vector.load %arg2[%c0_1, %c0_2] : memref<128x128xbf16, #tpu.memory_space<vmem>>, vector<128x128xbf16>
    %cst = arith.constant dense<0.000000e+00> : vector<64x128xf32>
    %2 = tpu.matmul %0, %1, %cst {dimension_numbers = #tpu.dot_dimension_numbers<[1], [0], [0], [1], [0, 0, 1, 1], [], []>} : vector<64x128xbf16>, vector<128x128xbf16>, vector<64x128xf32> -> vector<64x128xf32>
    %c0_3 = arith.constant 0 : index
    %c0_4 = arith.constant 0 : index
    %3 = vector.load %arg3[%c0_3, %c0_4] : memref<1x128xf32, #tpu.memory_space<vmem>>, vector<1x128xf32>
    %4 = vector.broadcast %3 : vector<1x128xf32> to vector<64x128xf32>
    %5 = arith.addf %2, %4 : vector<64x128xf32>
    %6 = arith.truncf %5 : vector<64x128xf32> to vector<64x128xbf16>
    %c0_5 = arith.constant 0 : index
    %c0_6 = arith.constant 0 : index
    %7 = vector.load %arg4[%c0_5, %c0_6] : memref<64x128xbf16, #tpu.memory_space<vmem>>, vector<64x128xbf16>
    tpu.vector_store %arg4[%c0_5, %c0_6], %6 {strides = array<i32>} : memref<64x128xbf16, #tpu.memory_space<vmem>>, vector<64x128xbf16>,
    return
  }
  func.func @transform_0(%arg0: i32) -> (i32, i32) {
    %c0_i32 = arith.constant 0 : i32
    %c0_i32_0 = arith.constant 0 : i32
    return %arg0, %c0_i32 : i32, i32
  }
  func.func @transform_1(%arg0: i32) -> (i32, i32) {
    %c0_i32 = arith.constant 0 : i32
    %c0_i32_0 = arith.constant 0 : i32
    %c0_i32_1 = arith.constant 0 : i32
    return %c0_i32, %c0_i32_0 : i32, i32
  }
  func.func @transform_2(%arg0: i32) -> (i32, i32) {
    %c0_i32 = arith.constant 0 : i32
    %c0_i32_0 = arith.constant 0 : i32
    %c0_i32_1 = arith.constant 0 : i32
    return %c0_i32, %c0_i32_0 : i32, i32
  }
  func.func @transform_3(%arg0: i32) -> (i32, i32) {
    %c0_i32 = arith.constant 0 : i32
    %c0_i32_0 = arith.constant 0 : i32
    return %arg0, %c0_i32 : i32, i32
  }
}

</mosaic_0001>

<bundles_post_ra>
// kernel: tpu_custom_call.1
= control target key start
LH: loop header
LB: loop body
LE: loop exit
PB: predicated region body
PF: predicated region fallthrough
CT: control target
= control target key end

     0   :  { %8 = vsyncpa [#allocation3], 0  ;;  %s1054_s0 = inlined_call_operand.hbm [shape: bf16[128,128], index: 0, kind: input, shape index: {}]   ;;  %s1055_s1 = inlined_call_operand.hbm [shape: bf16[128,128], index: 1, kind: input, shape index: {}]   ;;  %s1056_s2 = inlined_call_operand.vmem [shape: f32[1,128], index: 2, kind: input, shape index: {}]   ;;  %s1057_s3 = inlined_call_operand.hbm [shape: bf16[128,128], index: 3, kind: output, shape index: {}]  }
   0x1   :  { %10 = vsyncpa [#allocation3 + $0x1], 0 }
   0x2   :  { %11 = vsyncpa [#allocation6], 0 }
   0x3   :  { %12 = vsyncpa [#allocation4], 0 }
   0x4   :  { %14 = vsyncpa [#allocation4 + $0x1], 0  ;;  %s858_s12 = smov 0   ;;  %s860_s13 = smov 0  }
   0x5   :  { %s862_s14 = smov 0   ;;  %s864_s15 = smov 0  }
   0x6 LB: > { %s879_s16 = sadd.s32 4294967295, %s829_s15   ;;  %s512_s17 = sadd.s32 4294967294, %s829_s15   ;;  %s829_s15 = sphi %s864_s15, %s1079_s15   ;;  %s825_s14 = sphi %s862_s14, %s1078_s14   ;;  %s821_s13 = sphi %s860_s13, %s1077_s13   ;;  %s817_s12 = sphi %s858_s12, %s1076_s12  }
   0x7   : > { %p40_p0 = scmp.ne.s32.totalorder %s821_s13, %s817_s12  ;;  %p1058_p1 = scmp.eq.s32.totalorder %s879_s16, 0 }
   0x8   : > { %p112_p3 = scmp.eq.s32.totalorder %s512_s17, 1  ;;  %p513_p5 = scmp.ge.s32.totalorder %s829_s15, 1 }
   0x9   : > { %p888_p4 = por %p1058_p1, %p40_p0  ;;  %p119_p7 = scmp.lt.s32.totalorder %s829_s15, 3 }
   0xa   : > { %p893_p6 = por %p112_p3, %p40_p0  ;;  %s831_s21 = smov [#allocation5]  }
   0xb   : > { %s1062_s18 = scalar_select %p888_p4, 1, 0 }
   0xc   : > { %s1063_s19 = scalar_select %p893_p6, 1, 0 }
   0xd   : > { %p898_p8 = pnand %p513_p5, %p119_p7  ;;  %s131_s22 = sshll.u32 %s831_s21, 4  ;;  %s132_s22 = int_to_ptr.vmem [resolvable:$true] %s131_s22 }
   0xe   : > { %s912_s24 = sadd.s32 1, %s829_s15   ;;  %s27_s25 = sadd.s32 1, %s825_s14 }
   0xf   : > { %s1064_s20 = scalar_select %p898_p8, 1, 0 }
  0x10   : > { %p642_p9 = pneg %p898_p8  ;;  %s24_s26 = ssub.s32 %s829_s15, %s912_s24 }
  0x11   : > { %s718_s27 = scalar_lea.vmem %s132_s22, 1024  ;;  %p726_p5 = scmp.lt.s32.totalorder %s132_s22, %s132_s22 }
  0x12   : > { %p907_p11 = pnand %p642_p9, %p1058_p1  ;;  %p719_p13 = scmp.ne.s32.totalorder %s132_s22, %s718_s27 }
  0x13   : > { %p727_p7 = scmp.lt.s32.totalorder %s718_s27, %s718_s27 }
  0x14   : > { %p709_p12 = pneg %p907_p11 }
  0x15   : > { %p728_p10 = por %p727_p7, %p726_p5 }
  0x16   : > { %p721_p0 = pnand %p719_p13, %p709_p12 }
  0x18   : > { %p722_p3 = pneg %p721_p0 }
  0x1a   : > { %p729_p2 = pnand %p728_p10, %p722_p3 }
  0x1c   : > { %732 = shalt.err (!%p729_p2)
}
  0x1d   : > { %s832_s28 = smov 64   ;;  %s833_s29 = smov 4  }
  0x1e   : > { %645 = dma.hbm_to_vmem [thread:$0]  (!%p907_p11), %s1055_s1, 1024, %s132_s22, [#allocation6], %s832_s28, %s832_s28, %s833_s29  }
  0x1f   : > { %p25_p2 = scmp.eq.s32.totalorder %s24_s26, 0  ;;  %p34_p9 = scmp.ne.s32.totalorder %s825_s14, %s821_s13 }
  0x20   : > { %p35_p10 = scmp.eq.s32.totalorder %s829_s15, 0  ;;  %p655_p12 = scmp.lt.s32.totalorder %s829_s15, 2 }
  0x21   : > { %s932_s5 = scalar_select %p25_p2, %s825_s14, %s27_s25  }
  0x22   : > { %p36_p13 = por %p35_p10, %p34_p9  ;;  %p1066_p0 = scmp.eq.s32.totalorder %s879_s16, 1 }
  0x23   : > { %s148_s7 = sand.u32 1, %s825_s14   ;;  %s549_s8 = sshll.u32 %s829_s15, 9 }
  0x24   : > { %p936_p3 = por %p1066_p0, %p34_p9  ;;  %s516_s9 = sshll.u32 %s148_s7, 5 }
  0x25   : > { %s945_s17 = scalar_lea.hbm %s1054_s0, %s549_s8  ;;  %s152_s21 = scalar_lea.vmem [#allocation2], %s516_s9 }
  0x26   : > { %s1067_s6 = scalar_select %p936_p3, 1, 0 }
  0x27   : > { %s159_s22 = sshll.u32 %s152_s21, 4  ;;  %p947_p11 = pnand %p655_p12, %p36_p13  ;;  %s951_s22 = int_to_ptr.vmem [resolvable:$true] %s159_s22 }
  0x28   : > { %s953_s25 = scalar_lea.sflag [#allocation3], %s148_s7  ;;  %s733_s26 = scalar_lea.hbm %s945_s17, 512 }
  0x29   : > { %p734_p5 = scmp.ne.s32.totalorder %s945_s17, %s733_s26  ;;  %p735_p7 = pneg %p947_p11 }
  0x2a   : > { %s738_s4 = scalar_lea.hbm %s1054_s0, 1024  ;;  %p739_p10 = scmp.lt.s32.totalorder %s945_s17, %s1054_s0 }
  0x2b   : > { %p736_p2 = pnand %p735_p7, %p734_p5  ;;  %p740_p12 = scmp.lt.s32.totalorder %s738_s4, %s733_s26 }
  0x2d   : > { %p737_p9 = pneg %p736_p2  ;;  %p741_p13 = por %p740_p12, %p739_p10 }
  0x2f   : > { %p742_p0 = pnand %p741_p13, %p737_p9 }
  0x31   : > { %745 = shalt.err (!%p742_p0)
}
  0x32   : > { %s746_s7 = scalar_lea.vmem %s951_s22, 512  ;;  %s834_s10 = smov [#allocation2]  }
  0x33   : > { %p747_p1 = scmp.ne.s32.totalorder %s951_s22, %s746_s7  ;;  %s751_s11 = sshll.u32 %s834_s10, 4  ;;  %s752_s11 = int_to_ptr.vmem [resolvable:$false] %s751_s11 }
  0x34   : > { %s753_s21 = scalar_lea.vmem %s752_s11, 1024  ;;  %p754_p2 = scmp.lt.s32.totalorder %s951_s22, %s752_s11 }
  0x35   : > { %p749_p6 = pnand %p747_p1, %p735_p7  ;;  %p755_p3 = scmp.lt.s32.totalorder %s753_s21, %s746_s7 }
  0x37   : > { %p750_p5 = pneg %p749_p6  ;;  %p756_p4 = por %p755_p3, %p754_p2 }
  0x39   : > { %p757_p8 = pnand %p756_p4, %p750_p5 }
  0x3b   : > { %760 = shalt.err (!%p757_p8)
}
  0x3c   : > { %649 = dma.hbm_to_vmem [thread:$0]  (!%p947_p11), %s945_s17, 512, %s951_s22, %s953_s25, %s832_s28, %s832_s28, %s833_s29  }
  0x3d   : > { %p1069_p1 = scmp.ne.s32.totalorder %s1064_s20, 0 }
  0x3e   : > { %s980_s26 = sand.u32 (!%p1069_p1), 1, %s821_s13   ;;  %p1070_p4 = scmp.ne.s32.totalorder (!%p1069_p1), %s1062_s18, 0 }
  0x3f   : > { %171 = sbr.rel (%p1069_p1) target bundleno = 322 (0x142), region = 32  ;;  %s520_s27 = sshll.u32 (!%p1069_p1), %s980_s26, 5 }
  0x40   : > { %s174_s30 = scalar_lea.sflag (!%p1069_p1), [#allocation3], %s980_s26  ;;  %s986_s23 = scalar_lea.vmem (!%p1069_p1), [#allocation2], %s520_s27 }
  0x44   : > { %804 = dma.done.wait (%p1070_p4), %s174_s30, 512  }
  0x45   : > { %806 = vsyncadd (%p1070_p4), %s174_s30, 4294966784  ;;  %p1071_p6 = scmp.eq.s32.totalorder %s879_s16, 0 }
  0x47   : > { %808 = dma.done.wait (%p1071_p6), [#allocation6], 1024   ;;  %p1072_p8 = pmov %p1071_p6 }
  0x48   : > { %v695_v0 = vld [vmem:[#allocation5 + $0x38] sm:$0xff]   ;;  %v696_v1 = vld [vmem:[#allocation5 + $0x30] sm:$0xff]   ;;  %v697_v2 = vld [vmem:[#allocation5 + $0x28] sm:$0xff]   ;;  %s203_s28 = scalar_lea.vmem [#allocation7], %s520_s27  ;;  %s558_s17 = sshll.u32 %s879_s16, 9 }
  0x49   : > { %810 = vsyncadd (%p1072_p8), [#allocation6], 4294966272  ;;  %594 = vmatprep.subr.bf16.mxu0 %v695_v0  ;;  %618 = vmatprep.subr.bf16.mxu1 %v695_v0  ;;  %v698_v3 = vld [vmem:[#allocation5 + $0x20] sm:$0xff]   ;;  %v704_v5 = vld [vmem:[%s986_s23 + $0x10] sm:$0xff]   ;;  %s429_s29 = sshll.u32 %s203_s28, 4  ;;  %s1011_s4 = scalar_lea.hbm %s1057_s3, %s558_s17  ;;  %s1006_s29 = int_to_ptr.vmem [resolvable:$true] %s429_s29 }
  0x4a   : > { %595 = vmatpush3.bf16.msra.mxu0 %v695_v0  ;;  %626 = vmatpush3.bf16.msra.mxu1 %v695_v0  ;;  %v703_v4 = vld [vmem:[%s986_s23] sm:$0xff]   ;;  %v699_v6 = vld [vmem:[#allocation5 + $0x18] sm:$0xff]   ;;  %v700_v7 = vld [vmem:[#allocation5 + $0x10] sm:$0xff]   ;;  %s416_s16 = scalar_lea.sflag [#allocation4], %s980_s26  ;;  %s761_s8 = scalar_lea.vmem %s1006_s29, 512 }
  0x4b   : > { %596 = vmatprep.subr.bf16.mxu0 %v696_v1  ;;  %619 = vmatprep.subr.bf16.mxu1 %v696_v1  ;;  %v701_v8 = vld [vmem:[#allocation5 + $0x8] sm:$0xff]   ;;  %v702_v9 = vld [vmem:[#allocation5] sm:$0xff]   ;;  %v706_v11 = vld [vmem:[%s986_s23 + $0x18] sm:$0xff]   ;;  %p762_p3 = scmp.ne.s32.totalorder %s1006_s29, %s761_s8  ;;  %p1073_p11 = scmp.ne.s32.totalorder %s1067_s6, 0 }
  0x4c   : > { %610 = vmatprep.mubr.bf16.mxu0 %v703_v4  ;;  %614 = vmatprep.mubr.bf16.mxu1 %v704_v5  ;;  %v705_v10 = vld [vmem:[%s986_s23 + $0x8] sm:$0xff]   ;;  %v523_v14 = vld [vmem:[%s1056_s2] ss:$0 sm:$0xff]  ;;  %s835_s9 = smov [#allocation7]  }
  0x4d   : > { %p763_p7 = pnand %p762_p3, %p1073_p11  ;;  %s765_s7 = sshll.u32 %s835_s9, 4  ;;  %s766_s7 = int_to_ptr.vmem [resolvable:$false] %s765_s7 }
  0x4e   : > { %597 = vmatpush3.bf16.msra.mxu0 %v696_v1  ;;  %627 = vmatpush3.bf16.msra.mxu1 %v696_v1  ;;  %s767_s10 = scalar_lea.vmem %s766_s7, 1024  ;;  %p768_p10 = scmp.lt.s32.totalorder %s1006_s29, %s766_s7 }
  0x4f   : > { %598 = vmatprep.subr.bf16.mxu0 %v697_v2  ;;  %620 = vmatprep.subr.bf16.mxu1 %v697_v2  ;;  %p764_p9 = pneg %p763_p7  ;;  %p769_p12 = scmp.lt.s32.totalorder %s767_s10, %s761_s8 }
  0x51   : > { %p770_p13 = por %p769_p12, %p768_p10 }
  0x52   : > { %599 = vmatpush3.bf16.msra.mxu0 %v697_v2  ;;  %628 = vmatpush3.bf16.msra.mxu1 %v697_v2 }
  0x53   : > { %600 = vmatprep.subr.bf16.mxu0 %v698_v3  ;;  %621 = vmatprep.subr.bf16.mxu1 %v698_v3  ;;  %p771_p0 = pnand %p770_p13, %p764_p9 }
  0x56   : > { %601 = vmatpush3.bf16.msra.mxu0 %v698_v3  ;;  %629 = vmatpush3.bf16.msra.mxu1 %v698_v3 }
  0x57   : > { %602 = vmatprep.subr.bf16.mxu0 %v699_v6  ;;  %622 = vmatprep.subr.bf16.mxu1 %v699_v6 }
  0x5a   : > { %603 = vmatpush3.bf16.msra.mxu0 %v699_v6  ;;  %630 = vmatpush3.bf16.msra.mxu1 %v699_v6 }
  0x5b   : > { %604 = vmatprep.subr.bf16.mxu0 %v700_v7  ;;  %623 = vmatprep.subr.bf16.mxu1 %v700_v7 }
  0x5e   : > { %605 = vmatpush3.bf16.msra.mxu0 %v700_v7  ;;  %631 = vmatpush3.bf16.msra.mxu1 %v700_v7 }
  0x5f   : > { %606 = vmatprep.subr.bf16.mxu0 %v701_v8  ;;  %624 = vmatprep.subr.bf16.mxu1 %v701_v8 }
  0x62   : > { %607 = vmatpush3.bf16.msra.mxu0 %v701_v8  ;;  %632 = vmatpush3.bf16.msra.mxu1 %v701_v8 }
  0x63   : > { %608 = vmatprep.subr.bf16.mxu0 %v702_v9  ;;  %625 = vmatprep.subr.bf16.mxu1 %v702_v9 }
  0x66   : > { %609 = vmatpush3.bf16.msra.mxu0 %v702_v9  ;;  %633 = vmatpush3.bf16.msra.mxu1 %v702_v9 }
  0x69   : > { %611 = vmatmul.mubr.bf16.vlgmr.msra.gmra.mxu0 %v705_v10  ;;  %615 = vmatmul.mubr.bf16.vlgmr.msra.gmra.mxu1 %v706_v11 }
 0x129   : > { %v612_v12 = vpop.f32.mrf.mxu0  ;;  %v616_v13 = vpop.f32.mrf.mxu1 }
 0x12a   : > { %v353_v19 = vadd.f32 %v612_v12, %v523_v14  ;;  %v369_v20 = vadd.f32 %v616_v13, %v523_v14 }
 0x12b   : > { %v344_v15 = vpop.f32.mrf.mxu0  ;;  %v360_v16 = vpop.f32.mrf.mxu1 }
 0x12c   : > { %v345_v23 = vadd.f32 %v523_v14, %v344_v15  ;;  %v361_v24 = vadd.f32 %v523_v14, %v360_v16 }
 0x12d   : > { %v613_v17 = vpop.f32.mrf.mxu0  ;;  %v617_v18 = vpop.f32.mrf.mxu1 }
 0x12e   : > { %v356_v21 = vadd.f32 %v613_v17, %v523_v14  ;;  %v372_v22 = vadd.f32 %v617_v18, %v523_v14 }
 0x12f   : > { %v347_v25 = vpop.f32.mrf.mxu0  ;;  %v363_v26 = vpop.f32.mrf.mxu1 }
 0x130   : > { %v567_v27 = vpack.c.bf16 %v356_v21, %v353_v19  ;;  %v577_v28 = vpack.c.bf16 %v372_v22, %v369_v20  ;;  %v348_v29 = vadd.f32 %v523_v14, %v347_v25  ;;  %v364_v30 = vadd.f32 %v523_v14, %v363_v26 }
 0x132   : > { %579 = vst [vmem:[%s203_s28 + $0x8] sm:$0xff] %v567_v27   ;;  %581 = vst [vmem:[%s203_s28 + $0x18] sm:$0xff] %v577_v28   ;;  %v562_v31 = vpack.c.bf16 %v348_v29, %v345_v23  ;;  %v572_v32 = vpack.c.bf16 %v364_v30, %v361_v24 }
 0x134   : > { %563 = vst [vmem:[%s203_s28] sm:$0xff] %v562_v31   ;;  %580 = vst [vmem:[%s203_s28 + $0x10] sm:$0xff] %v572_v32  }
 0x135   : > { %774 = shalt.err (!%p771_p0)
}
 0x136   : > { %s775_s11 = scalar_lea.hbm %s1011_s4, 512  ;;  %s779_s30 = scalar_lea.hbm %s1057_s3, 1024 }
 0x137   : > { %p776_p5 = scmp.ne.s32.totalorder %s1011_s4, %s775_s11  ;;  %p780_p4 = scmp.lt.s32.totalorder %s1011_s4, %s1057_s3 }
 0x138   : > { %p781_p6 = scmp.lt.s32.totalorder %s779_s30, %s775_s11 }
 0x139   : > { %p777_p2 = pnand %p776_p5, %p1073_p11 }
 0x13a   : > { %p782_p8 = por %p781_p6, %p780_p4 }
 0x13b   : > { %p778_p1 = pneg %p777_p2 }
 0x13d   : > { %p783_p3 = pnand %p782_p8, %p778_p1 }
 0x13f   : > { %786 = shalt.err (!%p783_p3)
}
 0x140   : > { %s836_s20 = smov 64   ;;  %s837_s28 = smov 4  }
 0x141   : > { %640 = dma.vmem_to_hbm [thread:$0]  (%p1073_p11), %s1006_s29, 512, %s1011_s4, %s416_s16, %s836_s20, %s836_s20, %s837_s28  }
 0x142 PF: > { %s444_s17 = sand.u32 1, %s817_s12   ;;  %p1074_p7 = scmp.ne.s32.totalorder %s1063_s19, 0 }
 0x143   : > { %p1075_p9 = scmp.ge.s32.totalorder %s829_s15, 2  ;;  %s445_s22 = scalar_lea.sflag [#allocation4], %s444_s17 }
 0x145   : > { %p651_p10 = pnand %p1075_p9, %p1074_p7 }
 0x147   : > { %p652_p12 = pneg %p651_p10 }
 0x149   : > { %812 = dma.done.wait (%p652_p12), %s445_s22, 512  }
 0x14a   : > { %814 = vsyncadd (%p652_p12), %s445_s22, 4294966784  ;;  %p17_p13 = scmp.ge.s32.totalorder %s912_s24, 4   ;;  %s1076_s12 = smov %s821_s13 }
 0x14b   : > { %s1077_s13 = smov %s825_s14  ;;  %s1078_s14 = smov %s932_s5 }
 0x14c   : > { %s1079_s15 = smov %s912_s24  ;;  %19 = sbr.rel (!%p17_p13) target bundleno = 6 (0x6), region = 81 }
 0x151   :  { %450 = vsyncpa [#allocation3], 1 }
 0x152   :  { %452 = vsyncpa [#allocation3 + $0x1], 1 }
 0x153   :  { %453 = vsyncpa [#allocation6], 1 }
 0x154   :  { %454 = vsyncpa [#allocation4], 1 }
 0x155   :  { %456 = vsyncpa [#allocation4 + $0x1], 1 }

</bundles_post_ra>
